<compile_context>
chip_gen: v7x
topology: tpu7x:2x2x1
jax: 0.10.0
libtpu: 0.0.40
codegen_flags: <defaults>
</compile_context>

<pallas_src>
import jax
import jax.numpy as jnp
from jax.experimental import pallas as pl
from jax.experimental.pallas import tpu as pltpu

_LANE = 128


# --------------------------------------------------------------------------- #
# Kernel
# --------------------------------------------------------------------------- #
def _lora_linear_kernel(x_ref, w_ref, xa_ref, b_ref, o_ref, acc_ref):
    # x_ref:  (tm, tk)  activation tile
    # w_ref:  (tk, tn)  pre-transposed weight tile (lane = out_features)
    # xa_ref: (tm, r)   hoisted LoRA intermediate (x @ A^T)
    # b_ref:  (r, tn)   pre-transposed + pre-scaled lora_B tile
    # o_ref:  (tm, tn)  output tile
    # acc_ref:(tm, tn)  f32 accumulator scratch (persists across the K axis)
    k = pl.program_id(2)

    @pl.when(k == 0)
    def _init():
        acc_ref[...] = jnp.zeros_like(acc_ref)

    acc_ref[...] += jnp.dot(x_ref[...], w_ref[...],
                            preferred_element_type=jnp.float32)

    @pl.when(k == pl.num_programs(2) - 1)
    def _finish():
        lora = jnp.dot(xa_ref[...], b_ref[...],
                       preferred_element_type=jnp.float32)
        o_ref[...] = (acc_ref[...] + lora).astype(o_ref.dtype)


# --------------------------------------------------------------------------- #
# Helpers
# --------------------------------------------------------------------------- #
def _cdiv(a, b):
    return -(-a // b)


def _round_up(x, m):
    return _cdiv(x, m) * m


def _sublane_granule(dtype):
    itemsize = jnp.dtype(dtype).itemsize
    if itemsize >= 4:
        return 8
    if itemsize == 2:
        return 16
    return 32


def _vmem_capacity_bytes():
    try:
        info = pltpu.get_tpu_info()
        cap = int(getattr(info, "vmem_capacity_bytes", 0))
        if cap > 0:
            return cap
    except Exception:
        pass
    return 64 * 1024 * 1024  # conservative (v7x per-TC physical VMEM)


def _pick_tile(dim, target, align):
    """`dim` is a multiple of 128. Largest multiple of `align` (falling back to
    128) that divides `dim` and is <= target."""
    if dim <= target:
        return dim
    for a in (align, _LANE):
        if dim % a:
            continue
        t = max(a, (target // a) * a)
        while t >= a:
            if dim % t == 0:
                return t
            t -= a
    return dim  # unreachable: dim % 128 == 0


# --------------------------------------------------------------------------- #
# One-time parameter prep (model-load time, NOT the per-call hot path)
# --------------------------------------------------------------------------- #
def prepare_lora_params(weight, lora_A, lora_B, *, alpha=1.0,
                        compute_dtype=None, lane_align=_LANE):
    """Transpose / scale / pad the parameters once into MXU-native layout.

    weight: [out, in]   lora_A: [r, in]   lora_B: [out, r]
    Returns a dict consumed by `lora_linear`.
    """
    out_features, in_features = weight.shape
    r = int(lora_A.shape[0])
    scaling = alpha / r
    cdt = jnp.dtype(compute_dtype) if compute_dtype is not None else jnp.dtype(weight.dtype)

    K_pad = _round_up(in_features, lane_align)
    N_pad = _round_up(out_features, lane_align)

    w_t = jnp.transpose(weight).astype(cdt)                 # [K, N]
    a_t = jnp.transpose(lora_A).astype(cdt)                 # [K, r]
    b_t = (jnp.transpose(lora_B) * scaling).astype(cdt)     # [r, N], scale folded

    w_t = jnp.pad(w_t, ((0, K_pad - in_features), (0, N_pad - out_features)))
    a_t = jnp.pad(a_t, ((0, K_pad - in_features), (0, 0)))
    b_t = jnp.pad(b_t, ((0, 0), (0, N_pad - out_features)))

    return dict(w_t=w_t, a_t=a_t, b_t=b_t, r=r,
                in_features=in_features, out_features=out_features,
                K_pad=K_pad, N_pad=N_pad, compute_dtype=cdt)


# --------------------------------------------------------------------------- #
# Forward
# --------------------------------------------------------------------------- #
def lora_linear(x, params, *, tm=512, tn=512, tk=2048, mxu_align=256):
    """Pallas implementation of LoRALinear.forward (dropout == 0)."""
    in_features = params["in_features"]
    out_features = params["out_features"]
    K_pad, N_pad = params["K_pad"], params["N_pad"]
    r = params["r"]
    cdt = params["compute_dtype"]
    w_t, a_t, b_t = params["w_t"], params["a_t"], params["b_t"]

    assert x.shape[-1] == in_features
    out_dtype = x.dtype

    lead_shape = x.shape[:-1]
    M = 1
    for d in lead_shape:
        M *= int(d)
    x2d = x.reshape(M, in_features).astype(cdt)
    if K_pad != in_features:
        x2d = jnp.pad(x2d, ((0, 0), (0, K_pad - in_features)))

    # Hoisted LoRA intermediate: tiny [M, r] matmul, done once per call.
    xa = jnp.dot(x2d, a_t, preferred_element_type=jnp.float32).astype(cdt)

    # ---- tile selection under a generation-aware VMEM budget ---------------
    cds = jnp.dtype(cdt).itemsize
    ods = jnp.dtype(out_dtype).itemsize
    sub = _sublane_granule(cdt)

    tn_eff = _pick_tile(N_pad, tn, mxu_align)
    tk_eff = _pick_tile(K_pad, tk, mxu_align)
    tm_cap = max(sub, min(tm, _round_up(M, sub)))

    def _footprint(tm_, tn_, tk_):
        # double-buffered inputs + output, single f32 accumulator scratch
        return (2 * (tm_ * tk_ + tk_ * tn_ + tm_ * r + r * tn_) * cds
                + 2 * tm_ * tn_ * ods + tm_ * tn_ * 4)

    cap = _vmem_capacity_bytes()
    budget = (cap * 3) // 4  # keep full double-buffering even on v7x (64 MiB)
    for _ in range(32):
        if _footprint(tm_cap, tn_eff, tk_eff) <= budget:
            break
        if tk_eff > mxu_align and tk_eff > _LANE:
            tk_eff = _pick_tile(K_pad, max(_LANE, tk_eff // 2), mxu_align)
        elif tn_eff > mxu_align and tn_eff > _LANE:
            tn_eff = _pick_tile(N_pad, max(_LANE, tn_eff // 2), mxu_align)
        elif tm_cap > sub:
            tm_cap = max(sub, _round_up(tm_cap // 2, sub))
        else:
            break

    # Row tiling that minimizes tail padding (dtype-aware sublane granule).
    n_m_tiles = max(1, _cdiv(M, tm_cap))
    tm_eff = _round_up(_cdiv(M, n_m_tiles), sub)
    M_pad = n_m_tiles * tm_eff
    if M_pad != M:
        x2d = jnp.pad(x2d, ((0, M_pad - M), (0, 0)))
        xa = jnp.pad(xa, ((0, M_pad - M), (0, 0)))

    # v7x has 2 TensorCores: give the parallel (i, j) grid at least 2 tiles.
    if n_m_tiles * (N_pad // tn_eff) == 1 and N_pad % (2 * _LANE) == 0:
        tn_eff = N_pad // 2

    grid = (M_pad // tm_eff, N_pad // tn_eff, K_pad // tk_eff)

    # ---- cost estimate (accounts for W / x re-reads across the grid) -------
    gi, gj, _gk = grid
    bytes_accessed = (M_pad * K_pad * cds * gj        # x streamed once per N tile
                      + K_pad * N_pad * cds * gi      # W streamed once per M tile
                      + M_pad * r * cds * gj
                      + r * N_pad * cds * gi
                      + M_pad * N_pad * ods)
    cost = pl.CostEstimate(
        flops=2 * M * in_features * out_features + 2 * M * r * out_features,
        transcendentals=0,
        bytes_accessed=int(bytes_accessed),
    )

    fp = _footprint(tm_eff, tn_eff, tk_eff)
    vmem_limit = int(min(cap - (4 << 20), max(2 * fp + (4 << 20), 32 << 20)))

    out2d = pl.pallas_call(
        _lora_linear_kernel,
        out_shape=jax.ShapeDtypeStruct((M_pad, N_pad), out_dtype),
        grid_spec=pltpu.PrefetchScalarGridSpec(
            num_scalar_prefetch=0,
            grid=grid,
            in_specs=[
                pl.BlockSpec((tm_eff, tk_eff), lambda i, j, k: (i, k)),   # x
                pl.BlockSpec((tk_eff, tn_eff), lambda i, j, k: (k, j)),   # W_t
                pl.BlockSpec((tm_eff, r),      lambda i, j, k: (i, 0)),   # xa
                pl.BlockSpec((r, tn_eff),      lambda i, j, k: (0, j)),   # B_t
            ],
            out_specs=pl.BlockSpec((tm_eff, tn_eff), lambda i, j, k: (i, j)),
            scratch_shapes=[pltpu.VMEM((tm_eff, tn_eff), jnp.float32)],
        ),
        compiler_params=pltpu.CompilerParams(
            dimension_semantics=("parallel", "parallel", "arbitrary"),
            vmem_limit_bytes=vmem_limit,
        ),
        cost_estimate=cost,
    )(x2d, w_t, xa, b_t)

    return out2d[:M, :out_features].reshape(*lead_shape, out_features)


def _reference(x, weight, lora_A, lora_B, alpha):
    r = lora_A.shape[0]
    return x @ weight.T + (x @ lora_A.T @ lora_B.T) * (alpha / r)


# TODO(synk): nn.Dropout with p > 0 (training-time stochastic mask) is not
# implemented; the module default (p = 0 -> Identity) is what this kernel covers.

if __name__ == "__main__":
    in_features, out_features, r, alpha = 32, 32, 8, 1.0

    key = jax.random.PRNGKey(0)
    kw, ka, kb, kx1, kx2 = jax.random.split(key, 5)

    # Parameter init mirroring __init__:
    #   weight ~ randn(out, in); lora_A ~ randn(r, in)*0.01; lora_B ~ randn(out, r)*0.01
    weight = jax.random.normal(kw, (out_features, in_features), dtype=jnp.float32)
    lora_A = jax.random.normal(ka, (r, in_features), dtype=jnp.float32) * 0.01
    lora_B = jax.random.normal(kb, (out_features, r), dtype=jnp.float32) * 0.01

    # One-time layout prep (model-load time): f32 compute path.
    params_f32 = prepare_lora_params(weight, lora_A, lora_B, alpha=alpha)

    # Case 1: batch=2, seq=8.
    x1 = jax.random.normal(kx1, (2, 8, in_features), dtype=jnp.float32)
    out1 = jax.block_until_ready(lora_linear(x1, params_f32))
    ref1 = _reference(x1, weight, lora_A, lora_B, alpha)
    assert out1.shape == (2, 8, out_features)
    assert jnp.allclose(out1, ref1, atol=2e-3, rtol=2e-3), \
        float(jnp.max(jnp.abs(out1 - ref1)))

    # Case 2: batch=3, seq=5 (M=15 exercises the padded-tail path).
    x2 = jax.random.normal(kx2, (3, 5, in_features), dtype=jnp.float32)
    out2 = jax.block_until_ready(lora_linear(x2, params_f32))
    ref2 = _reference(x2, weight, lora_A, lora_B, alpha)
    assert out2.shape == (3, 5, out_features)
    assert jnp.allclose(out2, ref2, atol=2e-3, rtol=2e-3), \
        float(jnp.max(jnp.abs(out2 - ref2)))

    # Case 3: bf16 MXU path with f32 accumulation (performance mode).
    params_bf16 = prepare_lora_params(weight, lora_A, lora_B, alpha=alpha,
                                      compute_dtype=jnp.bfloat16)
    out3 = jax.block_until_ready(lora_linear(x1, params_bf16))
    assert out3.shape == (2, 8, out_features)
    assert jnp.allclose(out3.astype(jnp.float32), ref1, atol=2e-1, rtol=5e-2), \
        float(jnp.max(jnp.abs(out3.astype(jnp.float32) - ref1)))

    print("KERNEL_OK")
</pallas_src>

<mosaic_0001>
module attributes {stable_mosaic.version = 11 : i64} {
  func.func @_lora_linear_kernel(%arg0: i32, %arg1: i32, %arg2: i32, %arg3: memref<16x128xf32, #tpu.memory_space<vmem>>, %arg4: memref<128x128xf32, #tpu.memory_space<vmem>>, %arg5: memref<16x8xf32, #tpu.memory_space<vmem>>, %arg6: memref<8x128xf32, #tpu.memory_space<vmem>>, %arg7: memref<16x128xf32, #tpu.memory_space<vmem>>, %arg8: memref<16x128xf32, #tpu.memory_space<vmem>>) attributes {dimension_semantics = [#tpu.dimension_semantics<parallel>, #tpu.dimension_semantics<parallel>, #tpu.dimension_semantics<arbitrary>], iteration_bounds = array<i64: 1, 1, 1>, scalar_prefetch = 0 : i64, scratch_operands = 1 : i64, tpu.core_type = #tpu.core_type<tc>, window_params = [{transform_indices = @transform_0, window_bounds = array<i64: 16, 128>}, {transform_indices = @transform_1, window_bounds = array<i64: 128, 128>}, {transform_indices = @transform_2, window_bounds = array<i64: 16, 8>}, {transform_indices = @transform_3, window_bounds = array<i64: 8, 128>}, {transform_indices = @transform_4, window_bounds = array<i64: 16, 128>}]} {
    %c0_i32 = arith.constant 0 : i32
    %0 = arith.cmpi eq, %arg2, %c0_i32 : i32
    %1 = arith.extui %0 : i1 to i32
    %c0_i32_0 = arith.constant 0 : i32
    %2 = arith.cmpi ne, %1, %c0_i32_0 : i32
    scf.if %2 {
      %cst_10 = arith.constant 0.000000e+00 : f32
      %12 = vector.broadcast %cst_10 : f32 to vector<16x128xf32>
      %c0_11 = arith.constant 0 : index
      %c0_12 = arith.constant 0 : index
      %13 = vector.load %arg8[%c0_11, %c0_12] : memref<16x128xf32, #tpu.memory_space<vmem>>, vector<16x128xf32>
      tpu.vector_store %arg8[%c0_11, %c0_12], %12 {strides = array<i32>} : memref<16x128xf32, #tpu.memory_space<vmem>>, vector<16x128xf32>,
    } else {
    }
    %c0 = arith.constant 0 : index
    %c0_1 = arith.constant 0 : index
    %3 = vector.load %arg8[%c0, %c0_1] : memref<16x128xf32, #tpu.memory_space<vmem>>, vector<16x128xf32>
    %c0_2 = arith.constant 0 : index
    %c0_3 = arith.constant 0 : index
    %4 = vector.load %arg3[%c0_2, %c0_3] : memref<16x128xf32, #tpu.memory_space<vmem>>, vector<16x128xf32>
    %c0_4 = arith.constant 0 : index
    %c0_5 = arith.constant 0 : index
    %5 = vector.load %arg4[%c0_4, %c0_5] : memref<128x128xf32, #tpu.memory_space<vmem>>, vector<128x128xf32>
    %cst = arith.constant dense<0.000000e+00> : vector<16x128xf32>
    %6 = tpu.matmul %4, %5, %cst {dimension_numbers = #tpu.dot_dimension_numbers<[1], [0], [0], [1], [0, 0, 1, 1], [], []>} : vector<16x128xf32>, vector<128x128xf32>, vector<16x128xf32> -> vector<16x128xf32>
    %7 = arith.addf %3, %6 : vector<16x128xf32>
    %c0_6 = arith.constant 0 : index
    %c0_7 = arith.constant 0 : index
    %8 = vector.load %arg8[%c0_6, %c0_7] : memref<16x128xf32, #tpu.memory_space<vmem>>, vector<16x128xf32>
    tpu.vector_store %arg8[%c0_6, %c0_7], %7 {strides = array<i32>} : memref<16x128xf32, #tpu.memory_space<vmem>>, vector<16x128xf32>,
    %c0_i32_8 = arith.constant 0 : i32
    %9 = arith.cmpi eq, %arg2, %c0_i32_8 : i32
    %10 = arith.extui %9 : i1 to i32
    %c0_i32_9 = arith.constant 0 : i32
    %11 = arith.cmpi ne, %10, %c0_i32_9 : i32
    scf.if %11 {
      %c0_10 = arith.constant 0 : index
      %c0_11 = arith.constant 0 : index
      %12 = vector.load %arg5[%c0_10, %c0_11] : memref<16x8xf32, #tpu.memory_space<vmem>>, vector<16x8xf32>
      %c0_12 = arith.constant 0 : index
      %c0_13 = arith.constant 0 : index
      %13 = vector.load %arg6[%c0_12, %c0_13] : memref<8x128xf32, #tpu.memory_space<vmem>>, vector<8x128xf32>
      %cst_14 = arith.constant dense<0.000000e+00> : vector<16x128xf32>
      %14 = tpu.matmul %12, %13, %cst_14 {dimension_numbers = #tpu.dot_dimension_numbers<[1], [0], [0], [1], [0, 0, 1, 1], [], []>} : vector<16x8xf32>, vector<8x128xf32>, vector<16x128xf32> -> vector<16x128xf32>
      %c0_15 = arith.constant 0 : index
      %c0_16 = arith.constant 0 : index
      %15 = vector.load %arg8[%c0_15, %c0_16] : memref<16x128xf32, #tpu.memory_space<vmem>>, vector<16x128xf32>
      %16 = arith.addf %15, %14 : vector<16x128xf32>
      %c0_17 = arith.constant 0 : index
      %c0_18 = arith.constant 0 : index
      %17 = vector.load %arg7[%c0_17, %c0_18] : memref<16x128xf32, #tpu.memory_space<vmem>>, vector<16x128xf32>
      tpu.vector_store %arg7[%c0_17, %c0_18], %16 {strides = array<i32>} : memref<16x128xf32, #tpu.memory_space<vmem>>, vector<16x128xf32>,
    } else {
    }
    return
  }
  func.func @transform_0(%arg0: i32, %arg1: i32, %arg2: i32) -> (i32, i32) {
    %c0_i32 = arith.constant 0 : i32
    return %arg0, %arg2 : i32, i32
  }
  func.func @transform_1(%arg0: i32, %arg1: i32, %arg2: i32) -> (i32, i32) {
    %c0_i32 = arith.constant 0 : i32
    return %arg2, %arg1 : i32, i32
  }
  func.func @transform_2(%arg0: i32, %arg1: i32, %arg2: i32) -> (i32, i32) {
    %c0_i32 = arith.constant 0 : i32
    %c0_i32_0 = arith.constant 0 : i32
    return %arg0, %c0_i32 : i32, i32
  }
  func.func @transform_3(%arg0: i32, %arg1: i32, %arg2: i32) -> (i32, i32) {
    %c0_i32 = arith.constant 0 : i32
    %c0_i32_0 = arith.constant 0 : i32
    return %c0_i32, %arg1 : i32, i32
  }
  func.func @transform_4(%arg0: i32, %arg1: i32, %arg2: i32) -> (i32, i32) {
    %c0_i32 = arith.constant 0 : i32
    return %arg0, %arg1 : i32, i32
  }
}

</mosaic_0001>

<bundles_post_ra>
// kernel: tpu_custom_call.1
= control target key start
LH: loop header
LB: loop body
LE: loop exit
PB: predicated region body
PF: predicated region fallthrough
CT: control target
= control target key end

     0   :  { %9 = vsyncpa [#allocation4], 0  ;;  %s471_s0 = inlined_call_operand.vmem [shape: f32[16,128], index: 0, kind: input, shape index: {}]   ;;  %s472_s1 = inlined_call_operand.hbm [shape: f32[128,128], index: 1, kind: input, shape index: {}]   ;;  %s473_s2 = inlined_call_operand.vmem [shape: f32[16,8], index: 2, kind: input, shape index: {}]   ;;  %s474_s3 = inlined_call_operand.vmem [shape: f32[8,128], index: 3, kind: input, shape index: {}]   ;;  %s475_s4 = inlined_call_operand.hbm [shape: f32[16,128], index: 4, kind: output, shape index: {}]  }
   0x1   :  { %10 = vsyncpa [#allocation5], 0  ;;  %s397_s15 = smov [#allocation3]   ;;  %s349_s19 = scalar_lea.hbm %s472_s1, 2048 }
   0x2   :  { %s18_s16 = sshll.u32 %s397_s15, 4  ;;  %p350_p0 = scmp.ne.s32.totalorder %s472_s1, %s349_s19  ;;  %s19_s16 = int_to_ptr.vmem [resolvable:$true] %s18_s16 }
   0x3   :  { %p353_p1 = scmp.lt.u32.totalorder %s349_s19, %s472_s1 }
   0x5   :  { %p355_p2 = pnand %p353_p1, %p350_p0 }
   0x7   :  { %358 = shalt.err (!%p355_p2)
}
   0x8   :  { %s359_s24 = scalar_lea.vmem %s19_s16, 2048  ;;  %p364_p4 = scmp.lt.s32.totalorder %s19_s16, %s19_s16 }
   0x9   :  { %p360_p3 = scmp.ne.s32.totalorder %s19_s16, %s359_s24  ;;  %p365_p5 = scmp.lt.s32.totalorder %s359_s24, %s359_s24 }
   0xb   :  { %p366_p6 = por %p365_p5, %p364_p4 }
   0xd   :  { %p367_p7 = pnand %p366_p6, %p360_p3 }
   0xf   :  { %370 = shalt.err (!%p367_p7)
}
  0x10   :  { %s398_s25 = smov 128   ;;  %s399_s26 = smov 8  }
  0x11   :  { %24 = dma.hbm_to_vmem [thread:$0]  %s472_s1, 2048, %s19_s16, [#allocation4], %s398_s25, %s398_s25, %s399_s26  }
  0x12   :  { %393 = dma.done.wait [#allocation4], 2048  }
  0x13   :  { %394 = vsyncadd [#allocation4], 4294965248  ;;  %v42_v0 = vld [vmem:[#allocation3] sm:$0xff]  ;;  %v43_v1 = vld [vmem:[#allocation3 + $0x8] sm:$0xff]  ;;  %vm143_vm0 = vcmask 64512   ;;  %s400_s10 = smov [#allocation6]  }
  0x14   :  { %v44_v2 = vld [vmem:[#allocation3 + $0x10] sm:$0xff]  ;;  %v311_v3 = vpack.c.bf16 %v43_v1, %v42_v0  ;;  %v45_v4 = vld [vmem:[#allocation3 + $0x18] sm:$0xff]  ;;  %v46_v6 = vld [vmem:[#allocation3 + $0x20] sm:$0xff]  ;;  %s236_s11 = sshll.u32 %s400_s10, 4  ;;  %s237_s11 = int_to_ptr.vmem [resolvable:$true] %s236_s11 }
  0x15   :  { %v315_v5 = vpack.c.bf16 %v45_v4, %v44_v2  ;;  %v47_v7 = vld [vmem:[#allocation3 + $0x28] sm:$0xff]  ;;  %v48_v9 = vld [vmem:[#allocation3 + $0x30] sm:$0xff]  ;;  %v142_v10 = vld [vmem:[%s474_s3] sm:$0xff]  ;;  %s371_s12 = scalar_lea.vmem %s237_s11, 256  ;;  %p376_p9 = scmp.lt.s32.totalorder %s237_s11, %s237_s11 }
  0x16   :  { %312 = vmatprep.subr.bf16.mxu1 %v311_v3  ;;  %v319_v8 = vpack.c.bf16 %v47_v7, %v46_v6  ;;  %v140_v11 = vld [vmem:[%s473_s2] sm:$0xff]  ;;  %v49_v12 = vld [vmem:[#allocation3 + $0x38] sm:$0xff]  ;;  %306 = vmatprep.subr.mxu0 %v142_v10  ;;  %v141_v14 = vld [vmem:[%s473_s2 + $0x8] sm:$0xff]  ;;  %p372_p8 = scmp.ne.s32.totalorder %s237_s11, %s371_s12  ;;  %p377_p10 = scmp.lt.s32.totalorder %s371_s12, %s371_s12 }
  0x17   :  { %314 = vmatpush3.bf16.msra.mxu1 %v311_v3  ;;  %308 = vmatprep.mubr.msk.f32.mxu0 %vm143_vm0, %v140_v11  ;;  %v40_v13 = vld [vmem:[%s471_s0] sm:$0xff]  ;;  %v323_v15 = vpack.c.bf16 %v49_v12, %v48_v9  ;;  %v51_v17 = vld [vmem:[#allocation3 + $0x48] sm:$0xff]  ;;  %v52_v19 = vld [vmem:[#allocation3 + $0x50] sm:$0xff] }
  0x18   :  { %316 = vmatprep.subr.bf16.mxu1 %v315_v5  ;;  %307 = vmatpush3.msra.mxu0 %v142_v10  ;;  %v50_v16 = vld [vmem:[#allocation3 + $0x40] sm:$0xff]  ;;  %v53_v20 = vld [vmem:[#allocation3 + $0x58] sm:$0xff]  ;;  %v55_v23 = vld [vmem:[#allocation3 + $0x68] sm:$0xff]  ;;  %p378_p11 = por %p377_p10, %p376_p9 }
  0x19   :  { %303 = vmatprep.mubr.f32.mxu1 %v40_v13  ;;  %309 = vmatmul.mubr.msk.f32.vlgmr.msra.gmra.mrb[0].mxu0 %vm143_vm0, %v141_v14  ;;  %v327_v18 = vpack.c.bf16 %v51_v17, %v50_v16  ;;  %v331_v21 = vpack.c.bf16 %v53_v20, %v52_v19  ;;  %v54_v22 = vld [vmem:[#allocation3 + $0x60] sm:$0xff]  ;;  %v56_v25 = vld [vmem:[#allocation3 + $0x70] sm:$0xff]  ;;  %v57_v26 = vld [vmem:[#allocation3 + $0x78] sm:$0xff] }
  0x1a   :  { %v335_v24 = vpack.c.bf16 %v55_v23, %v54_v22  ;;  %v339_v27 = vpack.c.bf16 %v57_v26, %v56_v25  ;;  %v41_v28 = vld [vmem:[%s471_s0 + $0x8] sm:$0xff]  ;;  %p379_p12 = pnand %p378_p11, %p372_p8 }
  0x1b   :  { %318 = vmatpush3.bf16.msra.mxu1 %v315_v5 }
  0x1c   :  { %320 = vmatprep.subr.bf16.mxu1 %v319_v8 }
  0x1f   :  { %322 = vmatpush3.bf16.msra.mxu1 %v319_v8 }
  0x20   :  { %324 = vmatprep.subr.bf16.mxu1 %v323_v15 }
  0x23   :  { %326 = vmatpush3.bf16.msra.mxu1 %v323_v15 }
  0x24   :  { %328 = vmatprep.subr.bf16.mxu1 %v327_v18 }
  0x27   :  { %330 = vmatpush3.bf16.msra.mxu1 %v327_v18 }
  0x28   :  { %332 = vmatprep.subr.bf16.mxu1 %v331_v21 }
  0x2b   :  { %334 = vmatpush3.bf16.msra.mxu1 %v331_v21 }
  0x2c   :  { %336 = vmatprep.subr.bf16.mxu1 %v335_v24 }
  0x2f   :  { %338 = vmatpush3.bf16.msra.mxu1 %v335_v24 }
  0x30   :  { %340 = vmatprep.subr.bf16.mxu1 %v339_v27 }
  0x33   :  { %342 = vmatpush3.bf16.msra.mxu1 %v339_v27 }
  0x36   :  { %304 = vmatmul.mubr.f32.vlgmr.msra.gmra.mrb[0].mxu1 %v41_v28 }
  0xec   :  { %v310_v29 = vpop.f32.mrb[0].mxu0 }
  0xed   :  { %v216_v30 = vpop.f32.mrb[1].mxu0 }
 0x109   :  { %v305_v31 = vpop.f32.mrb[0].mxu1 }
 0x10a   :  { %v228_v32 = vadd.f32 %v310_v29, %v305_v31  ;;  %v124_v33 = vpop.f32.mrb[1].mxu1 }
 0x10b   :  { %v227_v34 = vadd.f32 %v216_v30, %v124_v33 }
 0x10c   :  { %230 = vst [vmem:[#allocation6 + $0x8] sm:$0xff] %v228_v32 }
 0x10d   :  { %229 = vst [vmem:[#allocation6] sm:$0xff] %v227_v34 }
 0x10e   :  { %382 = shalt.err (!%p379_p12)
}
 0x10f   :  { %s383_s14 = scalar_lea.hbm %s475_s4, 256 }
 0x110   :  { %p384_p13 = scmp.ne.s32.totalorder %s475_s4, %s383_s14  ;;  %p387_p0 = scmp.lt.u32.totalorder %s383_s14, %s475_s4 }
 0x112   :  { %p389_p1 = pnand %p387_p0, %p384_p13 }
 0x114   :  { %392 = shalt.err (!%p389_p1)
}
 0x115   :  { %242 = dma.vmem_to_hbm [thread:$0]  %s237_s11, 256, %s475_s4, [#allocation5], %s398_s25, %s398_s25, %s399_s26  }
 0x116   :  { %395 = dma.done.wait [#allocation5], 256  }
 0x117   :  { %396 = vsyncadd [#allocation5], 4294967040 }
 0x118   :  { %246 = vsyncpa [#allocation4], 1 }
 0x119   :  { %247 = vsyncpa [#allocation5], 1 }

</bundles_post_ra>
